<compile_context>
chip_gen: v5e
topology: v5e:2x2
jax: 0.10.0
libtpu: 0.0.40
codegen_flags: <defaults>
</compile_context>

<pallas_src>
import functools

import jax
import jax.numpy as jnp
import numpy as np
from jax import lax
from jax.experimental import pallas as pl
from jax.experimental.pallas import tpu as pltpu


_MIB = 1024 * 1024


def _vmem_limit_bytes():
    """Per-generation scoped-VMEM limit (~100 MiB on v5e/v6e, ~56 MiB on v7x)."""
    try:
        cap = pltpu.get_tpu_info().vmem_capacity_bytes
        return int(min(100 * _MIB, (cap * 7) // 8))
    except Exception:
        return 64 * _MIB


def _round_up(x, m):
    return ((x + m - 1) // m) * m


def _pick_tile(dim, candidates):
    """Largest candidate tile that evenly divides `dim`, else the full dim."""
    for c in candidates:
        if c <= dim and dim % c == 0:
            return c
    return dim


# ---------------------------------------------------------------------------
# Kernel 1: tiled fused linear    out[g] = x @ w[g] + b[g]
#   x: (M, K) bf16   w: (G, K, N) bf16 (pre-transposed)   b: (G, 1, N) f32
#   out: (G, M, N)
# Grid: (G, M//tm, N//tn, K//tk)  -- reduction axis (K) last.
# ---------------------------------------------------------------------------
def _linear_kernel(x_ref, w_ref, b_ref, o_ref, acc_ref):
    k = pl.program_id(3)

    @pl.when(k == 0)
    def _():
        acc_ref[...] = jnp.zeros_like(acc_ref)

    acc_ref[...] += jnp.dot(x_ref[...], w_ref[0],
                            preferred_element_type=jnp.float32)

    @pl.when(k == pl.num_programs(3) - 1)
    def _():
        o_ref[0] = (acc_ref[...] + b_ref[0]).astype(o_ref.dtype)


def fused_linear(x2d, w3, b3, out_dtype):
    """x2d: (M, K);  w3: (G, K, N);  b3: (G, 1, N)  ->  (G, M, N)."""
    M, K = x2d.shape
    G, Kw, N = w3.shape
    assert Kw == K

    tm = _pick_tile(M, (256, 128, 64, 32, 16, 8))   # sublane axis
    tk = _pick_tile(K, (1024, 512, 256, 128))       # lane axis of x (or full K)
    tn = _pick_tile(N, (512, 256, 128))             # lane axis of w/out (or full N)

    grid = (G, M // tm, N // tn, K // tk)

    return pl.pallas_call(
        _linear_kernel,
        out_shape=jax.ShapeDtypeStruct((G, M, N), out_dtype),
        grid=grid,
        in_specs=[
            pl.BlockSpec((tm, tk), lambda g, i, j, k: (i, k)),
            pl.BlockSpec((1, tk, tn), lambda g, i, j, k: (g, k, j)),
            pl.BlockSpec((1, 1, tn), lambda g, i, j, k: (g, 0, j)),
        ],
        out_specs=pl.BlockSpec((1, tm, tn), lambda g, i, j, k: (g, i, j)),
        scratch_shapes=[pltpu.VMEM((tm, tn), jnp.float32)],
        compiler_params=pltpu.CompilerParams(
            dimension_semantics=("parallel", "parallel", "parallel", "arbitrary"),
            vmem_limit_bytes=_vmem_limit_bytes()),
    )(x2d, w3, b3)


# ---------------------------------------------------------------------------
# Kernel 2: flash-style attention  softmax(Q K^T) V with head-batched matmuls.
# Q already carries the 1/sqrt(head_dim) scaling (folded into q weights).
# Input qkv layout: (3, B, Tp, E); output: (B, Tp, E) -- heads already merged.
# Grid: (B, Tp//tq, Tp//tkv) with the KV axis last ("arbitrary").
# ---------------------------------------------------------------------------
def _attn_kernel(q_ref, k_ref, v_ref, o_ref, m_sc, l_sc, acc_sc,
                 *, num_heads, head_dim, kv_tile, seq_len, padded_len):
    kv = pl.program_id(2)

    @pl.when(kv == 0)
    def _():
        m_sc[...] = jnp.full_like(m_sc, -jnp.inf)
        l_sc[...] = jnp.zeros_like(l_sc)
        acc_sc[...] = jnp.zeros_like(acc_sc)

    tq = q_ref.shape[2]
    q = q_ref[0, 0].reshape(tq, num_heads, head_dim)        # (tq,  H, Dh)
    k = k_ref[0, 0].reshape(kv_tile, num_heads, head_dim)   # (tkv, H, Dh)
    v = v_ref[0, 0].reshape(kv_tile, num_heads, head_dim)   # (tkv, H, Dh)

    # Scores: batch over heads, contract head_dim (no k.T transpose) -> (H, tq, tkv)
    s = lax.dot_general(q, k, (((2,), (2,)), ((1,), (1,))),
                        preferred_element_type=jnp.float32)

    # Mask keys beyond the true (unpadded) sequence length (static decision).
    if padded_len > seq_len:
        key_pos = kv * kv_tile + lax.broadcasted_iota(jnp.int32, s.shape, 2)
        s = jnp.where(key_pos < seq_len, s, -1e30)

    # Online softmax update.
    m_prev = m_sc[...]
    m_new = jnp.maximum(m_prev, s.max(axis=-1, keepdims=True))
    alpha = jnp.exp(m_prev - m_new)
    p = jnp.exp(s - m_new)
    l_sc[...] = alpha * l_sc[...] + p.sum(axis=-1, keepdims=True)
    pv = lax.dot_general(p.astype(v.dtype), v,
                         (((2,), (0,)), ((0,), (1,))),
                         preferred_element_type=jnp.float32)  # (H, tq, Dh)
    acc_sc[...] = alpha * acc_sc[...] + pv
    m_sc[...] = m_new

    @pl.when(kv == pl.num_programs(2) - 1)
    def _():
        out = acc_sc[...] * pl.reciprocal(l_sc[...], approx=True)   # (H, tq, Dh)
        out = out.transpose(1, 0, 2).reshape(tq, num_heads * head_dim)
        # One lane-dense (tq, E) store (heads already merged).
        o_ref[0] = out.astype(o_ref.dtype)


def pallas_attention(qkv, num_heads, seq_len):
    """qkv: (3, B, Tp, E)  ->  (B, Tp, E) attention output (heads merged)."""
    _, B, Tp, E = qkv.shape
    Dh = E // num_heads
    tq = _pick_tile(Tp, (256, 128, 64, 32, 16, 8))
    tkv = _pick_tile(Tp, (256, 128, 64, 32, 16, 8))
    nq = Tp // tq
    nkv = Tp // tkv

    kernel = functools.partial(_attn_kernel, num_heads=num_heads, head_dim=Dh,
                               kv_tile=tkv, seq_len=seq_len, padded_len=Tp)
    return pl.pallas_call(
        kernel,
        out_shape=jax.ShapeDtypeStruct((B, Tp, E), qkv.dtype),
        grid=(B, nq, nkv),
        in_specs=[
            pl.BlockSpec((1, 1, tq, E), lambda b, qi, ki: (0, b, qi, 0)),   # Q tile
            pl.BlockSpec((1, 1, tkv, E), lambda b, qi, ki: (1, b, ki, 0)),  # K chunk
            pl.BlockSpec((1, 1, tkv, E), lambda b, qi, ki: (2, b, ki, 0)),  # V chunk
        ],
        out_specs=pl.BlockSpec((1, tq, E), lambda b, qi, ki: (b, qi, 0)),
        scratch_shapes=[
            pltpu.VMEM((num_heads, tq, 1), jnp.float32),    # running max m
            pltpu.VMEM((num_heads, tq, 1), jnp.float32),    # running sum l
            pltpu.VMEM((num_heads, tq, Dh), jnp.float32),   # output accumulator
        ],
        compiler_params=pltpu.CompilerParams(
            dimension_semantics=("parallel", "parallel", "arbitrary"),
            vmem_limit_bytes=_vmem_limit_bytes()),
    )(qkv, qkv, qkv)


# ---------------------------------------------------------------------------
# Parameter preparation (done ONCE, not per forward call):
#   * transpose torch-layout (out,in) weights to (in,out), cast to bf16
#   * stack q/k/v into one (3, E, E) weight + (3, 1, E) bias (k bias = 0)
#   * fold the 1/sqrt(head_dim) scaling into the q weights/bias
# ---------------------------------------------------------------------------
def prepare_whisper_attention_params(params, num_heads,
                                     compute_dtype=jnp.bfloat16):
    E = params["q_w"].shape[0]
    scaling = (E // num_heads) ** (-0.5)
    wqkv = jnp.stack([(params["q_w"] * scaling).T,
                      params["k_w"].T,
                      params["v_w"].T], axis=0).astype(compute_dtype)    # (3, E, E)
    bqkv = jnp.stack([params["q_b"] * scaling,
                      jnp.zeros_like(params["q_b"]),                     # k: no bias
                      params["v_b"]], axis=0)[:, None, :].astype(jnp.float32)
    wo = params["o_w"].T[None].astype(compute_dtype)                     # (1, E, E)
    bo = params["o_b"][None, None, :].astype(jnp.float32)                # (1, 1, E)
    return {"wqkv": wqkv, "bqkv": bqkv, "wo": wo, "bo": bo}


# ---------------------------------------------------------------------------
# WhisperAttention forward (self-attention path)
# ---------------------------------------------------------------------------
def whisper_attention_forward(hidden_states, prepared, num_heads,
                              compute_dtype=jnp.bfloat16):
    B, T, E = hidden_states.shape
    out_dtype = hidden_states.dtype

    # Pad the sequence so tiles divide evenly (e.g. Whisper T=1500 -> 1536).
    # Padded keys are masked in the softmax; padded query rows are sliced off.
    pad_mult = 128 if T > 128 else 8
    Tp = _round_up(T, pad_mult)
    if Tp != T:
        hidden_states = jnp.pad(hidden_states, ((0, 0), (0, Tp - T), (0, 0)))

    x2d = hidden_states.reshape(B * Tp, E).astype(compute_dtype)

    # Fused Q/K/V projection -> (3, B*Tp, E); q pre-scaled, k bias = 0.
    qkv = fused_linear(x2d, prepared["wqkv"], prepared["bqkv"], compute_dtype)
    qkv = qkv.reshape(3, B, Tp, E)                 # free reshape (contiguous)

    # Flash-style attention; head split/merge handled inside the kernel.
    attn = pallas_attention(qkv, num_heads, seq_len=T)      # (B, Tp, E) bf16

    # Output projection (back to the input dtype).
    out = fused_linear(attn.reshape(B * Tp, E), prepared["wo"], prepared["bo"],
                       out_dtype)
    attn_output = out.reshape(B, Tp, E)[:, :T, :]

    # output_attentions=False -> None ; is_decoder=False -> no past_key_value.
    # TODO(synk): cross-attention / kv-cache / attention_mask / layer_head_mask
    # / dropout branches of the PyTorch module are not exercised here.
    return attn_output, None, None


# ---------------------------------------------------------------------------
# Pure-JAX reference (mirrors the PyTorch module) for a correctness check
# ---------------------------------------------------------------------------
def reference_forward(hidden_states, params, num_heads):
    B, T, E = hidden_states.shape
    Dh = E // num_heads
    scaling = Dh ** (-0.5)
    q = (hidden_states @ params["q_w"].T + params["q_b"]) * scaling
    k = hidden_states @ params["k_w"].T
    v = hidden_states @ params["v_w"].T + params["v_b"]

    def sh(t):
        return t.reshape(B, T, num_heads, Dh).transpose(0, 2, 1, 3)

    q, k, v = sh(q), sh(k), sh(v)
    w = jnp.einsum("bhtd,bhsd->bhts", q, k)
    w = jax.nn.softmax(w, axis=-1)
    o = jnp.einsum("bhts,bhsd->bhtd", w, v)
    o = o.transpose(0, 2, 1, 3).reshape(B, T, E)
    return o @ params["o_w"].T + params["o_b"]


# ---------------------------------------------------------------------------
if __name__ == "__main__":
    B, T, E, H = 2, 8, 32, 4        # batch, seq, embed_dim, num_heads
    key = jax.random.PRNGKey(0)
    ks = jax.random.split(key, 8)

    params = {
        "q_w": 0.05 * jax.random.normal(ks[0], (E, E), jnp.float32),
        "q_b": 0.05 * jax.random.normal(ks[1], (E,), jnp.float32),
        "k_w": 0.05 * jax.random.normal(ks[2], (E, E), jnp.float32),
        "v_w": 0.05 * jax.random.normal(ks[3], (E, E), jnp.float32),
        "v_b": 0.05 * jax.random.normal(ks[4], (E,), jnp.float32),
        "o_w": 0.05 * jax.random.normal(ks[5], (E, E), jnp.float32),
        "o_b": 0.05 * jax.random.normal(ks[6], (E,), jnp.float32),
    }
    hidden_states = jax.random.normal(ks[7], (B, T, E), jnp.float32)

    prepared = prepare_whisper_attention_params(params, H)
    out, attn_w, past_kv = whisper_attention_forward(hidden_states, prepared, H)
    out = jax.block_until_ready(out)

    ref = reference_forward(hidden_states, params, H)
    # Tolerance accounts for bf16 MXU inputs (f32 accumulation) and the EUP
    # approximate reciprocal in the softmax normalization.
    np.testing.assert_allclose(np.asarray(out, dtype=np.float32),
                               np.asarray(ref), rtol=2e-2, atol=2e-2)
    assert out.shape == (B, T, E)
    assert attn_w is None and past_kv is None
    print("KERNEL_OK")
</pallas_src>

<mosaic_0001>
module attributes {stable_mosaic.version = 11 : i64} {
  func.func @_linear_kernel(%arg0: i32, %arg1: i32, %arg2: i32, %arg3: i32, %arg4: memref<16x32xbf16, #tpu.memory_space<vmem>>, %arg5: memref<1x32x32xbf16, #tpu.memory_space<vmem>>, %arg6: memref<1x1x32xf32, #tpu.memory_space<vmem>>, %arg7: memref<1x16x32xbf16, #tpu.memory_space<vmem>>, %arg8: memref<16x32xf32, #tpu.memory_space<vmem>>) attributes {dimension_semantics = [#tpu.dimension_semantics<parallel>, #tpu.dimension_semantics<parallel>, #tpu.dimension_semantics<parallel>, #tpu.dimension_semantics<arbitrary>], iteration_bounds = array<i64: 3, 1, 1, 1>, scalar_prefetch = 0 : i64, scratch_operands = 1 : i64, tpu.core_type = #tpu.core_type<tc>, window_params = [{transform_indices = @transform_0, window_bounds = array<i64: 16, 32>}, {transform_indices = @transform_1, window_bounds = array<i64: 1, 32, 32>}, {transform_indices = @transform_2, window_bounds = array<i64: 1, 1, 32>}, {transform_indices = @transform_3, window_bounds = array<i64: 1, 16, 32>}]} {
    %c0_i32 = arith.constant 0 : i32
    %0 = arith.cmpi eq, %arg3, %c0_i32 : i32
    %1 = arith.extui %0 : i1 to i32
    %c0_i32_0 = arith.constant 0 : i32
    %2 = arith.cmpi ne, %1, %c0_i32_0 : i32
    scf.if %2 {
      %cst_11 = arith.constant 0.000000e+00 : f32
      %13 = vector.broadcast %cst_11 : f32 to vector<16x32xf32>
      %c0_12 = arith.constant 0 : index
      %c0_13 = arith.constant 0 : index
      %14 = vector.load %arg8[%c0_12, %c0_13] : memref<16x32xf32, #tpu.memory_space<vmem>>, vector<16x32xf32>
      tpu.vector_store %arg8[%c0_12, %c0_13], %13 {strides = array<i32>} : memref<16x32xf32, #tpu.memory_space<vmem>>, vector<16x32xf32>,
    } else {
    }
    %c0 = arith.constant 0 : index
    %c0_1 = arith.constant 0 : index
    %3 = vector.load %arg8[%c0, %c0_1] : memref<16x32xf32, #tpu.memory_space<vmem>>, vector<16x32xf32>
    %c0_2 = arith.constant 0 : index
    %c0_3 = arith.constant 0 : index
    %4 = vector.load %arg4[%c0_2, %c0_3] : memref<16x32xbf16, #tpu.memory_space<vmem>>, vector<16x32xbf16>
    %c0_4 = arith.constant 0 : index
    %c0_5 = arith.constant 0 : index
    %c0_6 = arith.constant 0 : index
    %5 = vector.load %arg5[%c0_4, %c0_5, %c0_6] : memref<1x32x32xbf16, #tpu.memory_space<vmem>>, vector<1x32x32xbf16>
    %6 = vector.shape_cast %5 : vector<1x32x32xbf16> to vector<32x32xbf16>
    %cst = arith.constant dense<0.000000e+00> : vector<16x32xf32>
    %7 = tpu.matmul %4, %6, %cst {dimension_numbers = #tpu.dot_dimension_numbers<[1], [0], [0], [1], [0, 0, 1, 1], [], []>} : vector<16x32xbf16>, vector<32x32xbf16>, vector<16x32xf32> -> vector<16x32xf32>
    %8 = arith.addf %3, %7 : vector<16x32xf32>
    %c0_7 = arith.constant 0 : index
    %c0_8 = arith.constant 0 : index
    %9 = vector.load %arg8[%c0_7, %c0_8] : memref<16x32xf32, #tpu.memory_space<vmem>>, vector<16x32xf32>
    tpu.vector_store %arg8[%c0_7, %c0_8], %8 {strides = array<i32>} : memref<16x32xf32, #tpu.memory_space<vmem>>, vector<16x32xf32>,
    %c0_i32_9 = arith.constant 0 : i32
    %10 = arith.cmpi eq, %arg3, %c0_i32_9 : i32
    %11 = arith.extui %10 : i1 to i32
    %c0_i32_10 = arith.constant 0 : i32
    %12 = arith.cmpi ne, %11, %c0_i32_10 : i32
    scf.if %12 {
      %c0_11 = arith.constant 0 : index
      %c0_12 = arith.constant 0 : index
      %13 = vector.load %arg8[%c0_11, %c0_12] : memref<16x32xf32, #tpu.memory_space<vmem>>, vector<16x32xf32>
      %c0_13 = arith.constant 0 : index
      %c0_14 = arith.constant 0 : index
      %c0_15 = arith.constant 0 : index
      %14 = vector.load %arg6[%c0_13, %c0_14, %c0_15] : memref<1x1x32xf32, #tpu.memory_space<vmem>>, vector<1x1x32xf32>
      %15 = vector.shape_cast %14 : vector<1x1x32xf32> to vector<1x32xf32>
      %16 = vector.broadcast %15 : vector<1x32xf32> to vector<16x32xf32>
      %17 = arith.addf %13, %16 : vector<16x32xf32>
      %18 = arith.truncf %17 : vector<16x32xf32> to vector<16x32xbf16>
      %c0_16 = arith.constant 0 : index
      %c0_17 = arith.constant 0 : index
      %c0_18 = arith.constant 0 : index
      %19 = vector.load %arg7[%c0_16, %c0_17, %c0_18] : memref<1x16x32xbf16, #tpu.memory_space<vmem>>, vector<1x16x32xbf16>
      %20 = vector.shape_cast %19 : vector<1x16x32xbf16> to vector<16x32xbf16>
      %21 = vector.shape_cast %18 : vector<16x32xbf16> to vector<1x16x32xbf16>
      tpu.vector_store %arg7[%c0_16, %c0_17, %c0_18], %21 {strides = array<i32>} : memref<1x16x32xbf16, #tpu.memory_space<vmem>>, vector<1x16x32xbf16>,
    } else {
    }
    return
  }
  func.func @transform_0(%arg0: i32, %arg1: i32, %arg2: i32, %arg3: i32) -> (i32, i32) {
    %c0_i32 = arith.constant 0 : i32
    return %arg1, %arg3 : i32, i32
  }
  func.func @transform_1(%arg0: i32, %arg1: i32, %arg2: i32, %arg3: i32) -> (i32, i32, i32) {
    %c0_i32 = arith.constant 0 : i32
    return %arg0, %arg3, %arg2 : i32, i32, i32
  }
  func.func @transform_2(%arg0: i32, %arg1: i32, %arg2: i32, %arg3: i32) -> (i32, i32, i32) {
    %c0_i32 = arith.constant 0 : i32
    %c0_i32_0 = arith.constant 0 : i32
    return %arg0, %c0_i32, %arg2 : i32, i32, i32
  }
  func.func @transform_3(%arg0: i32, %arg1: i32, %arg2: i32, %arg3: i32) -> (i32, i32, i32) {
    %c0_i32 = arith.constant 0 : i32
    return %arg0, %arg1, %arg2 : i32, i32, i32
  }
}

</mosaic_0001>

<bundles_post_ra>
// kernel: tpu_custom_call.1
= control target key start
LH: loop header
LB: loop body
LE: loop exit
PB: predicated region body
PF: predicated region fallthrough
CT: control target
= control target key end

     0   :  { %8 = vsyncpa [#allocation4], 0  ;;  %s1016_s0 = inlined_call_operand.hbm [shape: bf16[16,32], index: 0, kind: input, shape index: {}]   ;;  %s1017_s1 = inlined_call_operand.hbm [shape: bf16[3,32,32], index: 1, kind: input, shape index: {}]   ;;  %s1018_s2 = inlined_call_operand.hbm [shape: f32[3,1,32], index: 2, kind: input, shape index: {}]   ;;  %s1019_s3 = inlined_call_operand.hbm [shape: bf16[3,16,32], index: 3, kind: output, shape index: {}]  }
   0x1   :  { %9 = vsyncpa [#allocation7], 0 }
   0x2   :  { %11 = vsyncpa [#allocation7 + $0x1], 0 }
   0x3   :  { %12 = vsyncpa [#allocation5], 0 }
   0x4   :  { %14 = vsyncpa [#allocation5 + $0x1], 0  ;;  %s835_s12 = smov 0   ;;  %s837_s13 = smov 0  }
   0x5   :  { %s839_s14 = smov 0   ;;  %s841_s15 = smov 0  }
   0x6   :  { %s843_s16 = smov 0   ;;  %s845_s17 = smov 0  }
   0x7 LB: > { %s46_s18 = sadd.s32 1, %s803_s16  ;;  %s85_s19 = sadd.s32 1, %s795_s14  ;;  %s807_s17 = sphi %s845_s17, %s20_s17   ;;  %s803_s16 = sphi %s843_s16, %s1030_s16   ;;  %s799_s15 = sphi %s841_s15, %s1029_s15   ;;  %s795_s14 = sphi %s839_s14, %s1028_s14   ;;  %s791_s13 = sphi %s837_s13, %s1027_s13   ;;  %s787_s12 = sphi %s835_s12, %s1026_s12  }
   0x8   : > { %p48_p0 = scmp.ge.s32.totalorder %s46_s18, 3  ;;  %p92_p1 = scmp.ne.s32.totalorder %s795_s14, %s791_s13 }
   0x9   : > { %p93_p2 = scmp.eq.s32.totalorder %s807_s17, 0  ;;  %p573_p5 = scmp.lt.s32.totalorder %s807_s17, 3 }
   0xa   : > { %s1032_s18 = smov (%p48_p0, %s46_s18), 0  ;;  %s198_s22 = sand.u32 1, %s807_s17  }
   0xb   : > { %p875_p3 = por %p93_p2, %p92_p1  ;;  %s78_s21 = ssub.s32 %s803_s16, %s1032_s18 }
   0xc   : > { %p83_p4 = scmp.eq.s32.totalorder %s78_s21, 0  ;;  %s200_s23 = sand.u32 1, %s795_s14  }
   0xd   : > { %s517_s25 = sshll.u32 %s200_s23, 4  ;;  %s542_s26 = sshll.u32 %s803_s16, 4 }
   0xe   : > { %s885_s24 = scalar_select %p83_p4, %s795_s14, %s85_s19  }
   0xf   : > { %s210_s29 = scalar_lea.hbm %s1017_s1, %s542_s26  ;;  %s202_s30 = scalar_lea.vmem [#allocation6], %s517_s25 }
  0x10   : > { %s213_s4 = sshll.u32 %s202_s30, 4  ;;  %s211_s5 = sshll.u32 %s210_s29, 4  ;;  %s214_s4 = int_to_ptr.vmem [resolvable:$true] %s213_s4  ;;  %s212_s5 = int_to_ptr.hbm [resolvable:$true] %s211_s5 }
  0x11   : > { %p895_p6 = pnand %p573_p5, %p875_p3  ;;  %s899_s7 = scalar_lea.sflag [#allocation7], %s198_s22 }
  0x12   : > { %s809_s8 = smov 64   ;;  %s810_s9 = smov 4  }
  0x13   : > { %564 = dma.hbm_to_vmem [thread:$0]  (!%p895_p6), %s212_s5, 256, %s214_s4, %s899_s7, %s809_s8, %s809_s8, %s810_s9  }
  0x14   : > { %s908_s10 = sadd.s32 4294967295, %s807_s17   ;;  %s513_s11 = sadd.s32 4294967294, %s807_s17  }
  0x15   : > { %p98_p7 = scmp.ne.s32.totalorder %s791_s13, %s787_s12  ;;  %p99_p8 = scmp.eq.s32.totalorder %s908_s10, 0 }
  0x16   : > { %p154_p9 = scmp.eq.s32.totalorder %s908_s10, 2  ;;  %p160_p10 = scmp.eq.s32.totalorder %s513_s11, 2 }
  0x17   : > { %p514_p11 = scmp.ge.s32.totalorder %s807_s17, 1  ;;  %p918_p12 = por %p99_p8, %p98_p7 }
  0x18   : > { %p925_p13 = por %p154_p9, %p92_p1  ;;  %p929_p0 = por %p160_p10, %p98_p7 }
  0x19   : > { %p167_p2 = scmp.lt.s32.totalorder %s807_s17, 4  ;;  %s182_s26 = sshll.u32 %s1016_s0, 4  ;;  %s183_s26 = int_to_ptr.hbm [resolvable:$true] %s182_s26 }
  0x1a   : > { %s811_s28 = smov [#allocation3]   ;;  %s230_s5 = scalar_lea.hbm %s1018_s2, %s803_s16 }
  0x1b   : > { %p937_p3 = pnand %p514_p11, %p167_p2  ;;  %s184_s29 = sshll.u32 %s811_s28, 4  ;;  %s185_s29 = int_to_ptr.vmem [resolvable:$true] %s184_s29 }
  0x1c   : > { %s232_s11 = sshll.u32 %s230_s5, 4  ;;  %s226_s22 = scalar_lea.vmem [#allocation8], %s200_s23  ;;  %s233_s11 = int_to_ptr.hbm [resolvable:$true] %s232_s11 }
  0x1d   : > { %p557_p1 = pneg %p937_p3  ;;  %s234_s25 = sshll.u32 %s226_s22, 4  ;;  %s235_s25 = int_to_ptr.vmem [resolvable:$true] %s234_s25 }
  0x1e   : > { %567 = dma.hbm_to_vmem [thread:$0]  (!%p895_p6), %s233_s11, 16, %s235_s25, %s899_s7  }
  0x1f   : > { %p558_p4 = pnand %p557_p1, %p99_p8  ;;  %243 = sbr.rel (%p937_p3) target bundleno = 201 (0xc9), region = 32 }
  0x21   : > { %560 = dma.hbm_to_vmem [thread:$0]  (!%p558_p4), %s183_s26, 128, %s185_s29, [#allocation4], %s809_s8, %s809_s8, %s810_s9  }
  0x24   : > { %774 = dma.done.wait (%p99_p8), [#allocation4], 128  }
  0x25   : > { %776 = vsyncadd (%p99_p8), [#allocation4], 4294967168  ;;  %s250_s23 = sand.u32 1, %s908_s10   ;;  %s965_s28 = sand.u32 1, %s791_s13  }
  0x26   : > { %s522_s30 = sshll.u32 %s965_s28, 4  ;;  %s251_s8 = scalar_lea.sflag [#allocation7], %s250_s23 }
  0x27   : > { %s254_s6 = scalar_lea.vmem [#allocation6], %s522_s30 }
  0x28   : > { %778 = dma.done.wait (%p918_p12), %s251_s8, 272  }
  0x29   : > { %780 = vsyncadd (%p918_p12), %s251_s8, 4294967024  ;;  %vm299_vm0 = vcmask 261120   ;;  %v812_v0 = vmov 0.0   ;;  %v545_v1 = vld [vmem:[%s254_s6 + $0x8] sm:$0xff]  ;;  %v544_v2 = vld [vmem:[%s254_s6] sm:$0xff]  ;;  %s263_s7 = scalar_lea.vmem [#allocation8], %s965_s28 }
  0x2a   : > { %300 = vst.msk [vmem:[#allocation2] sm:$0xff] %vm299_vm0, %v812_v0  ;;  %337 = vmatpush.bf16.msra.mxu0 %v545_v1  ;;  %v543_v3 = vld [vmem:[#allocation3] sm:$0xff]  ;;  %v630_v8 = vld [vmem:[%s263_s7] ss:$0 sm:$0xff]  ;;  %s523_s9 = sshll.u32 %s965_s28, 3  ;;  %s546_s10 = sshll.u32 %s799_s15, 3 }
  0x2b   : > { %301 = vst.msk [vmem:[#allocation2 + $0x8] sm:$0xff] %vm299_vm0, %v812_v0  ;;  %vm362_vm1 = vcmask 257024   ;;  %s380_s27 = scalar_lea.hbm %s1019_s3, %s546_s10  ;;  %s290_s29 = scalar_lea.vmem [#allocation9], %s523_s9 }
  0x2c   : > { %s381_s4 = sshll.u32 %s290_s29, 4  ;;  %s383_s5 = sshll.u32 %s380_s27, 4  ;;  %s382_s4 = int_to_ptr.vmem [resolvable:$true] %s381_s4  ;;  %s384_s5 = int_to_ptr.hbm [resolvable:$true] %s383_s5 }
  0x2d   : > { %s366_s11 = scalar_lea.sflag [#allocation5], %s965_s28  ;;  %s735_s22 = sshra.s32 %s384_s5, 4  ;;  %s736_s22 = int_to_ptr.hbm [resolvable:$true] %s735_s22 }
  0x2e   : > { %338 = vmatpush.bf16.msra.mxu0 %v544_v2  ;;  %s737_s15 = scalar_lea.hbm %s736_s22, 8  ;;  %s741_s30 = scalar_lea.hbm %s1019_s3, 24 }
  0x2f   : > { %p738_p5 = scmp.ne.s32.totalorder %s736_s22, %s737_s15  ;;  %p742_p8 = scmp.lt.s32.totalorder %s736_s22, %s1019_s3 }
  0x30   : > { %p743_p9 = scmp.lt.s32.totalorder %s741_s30, %s737_s15 }
  0x31   : > { %536 = vmatmul.msk.bf16.vlgmr.msra.gmra.mxu0 %vm299_vm0, %v543_v3  ;;  %v302_v4 = vld [vmem:[#allocation2] sm:$0xff]  ;;  %p739_p6 = pnand %p738_p5, %p925_p13 }
  0x32   : > { %v303_v7 = vld [vmem:[#allocation2 + $0x8] sm:$0xff]  ;;  %p744_p10 = por %p743_p9, %p742_p8 }
  0x33   : > { %p740_p7 = pneg %p739_p6 }
  0x35   : > { %p745_p11 = pnand %p744_p10, %p740_p7 }
  0xae   : > { %v340_v5 = vpop.f32.mrf.mxu0 }
  0xaf   : > { %v345_v6 = vadd.f32 %v340_v5, %v302_v4 }
  0xb1   : > { %347 = vst.msk [vmem:[#allocation2] sm:$0xff] %vm299_vm0, %v345_v6 }
  0xb6   : > { %v342_v9 = vpop.f32.mrf.mxu0 }
  0xb7   : > { %v346_v10 = vadd.f32 %v342_v9, %v303_v7 }
  0xb8   : > { %v352_v11 = vld [vmem:[#allocation2] sm:$0xff] }
  0xb9   : > { %348 = vst.msk [vmem:[#allocation2 + $0x8] sm:$0xff] %vm299_vm0, %v346_v10  ;;  %v358_v12 = vadd.f32 %v630_v8, %v352_v11 }
  0xbb   : > { %v360_v13 = vpack.c.bf16 %v358_v12, %v358_v12 }
  0xbd   : > { %363 = vst.msk [vmem:[%s290_s29] sm:$0xf] %vm362_vm1, %v360_v13 }
  0xc0   : > { %v353_v14 = vld [vmem:[#allocation2 + $0x8] sm:$0xff] }
  0xc1   : > { %v359_v15 = vadd.f32 %v630_v8, %v353_v14 }
  0xc3   : > { %v361_v16 = vpack.c.bf16 %v359_v15, %v359_v15 }
  0xc5   : > { %364 = vst.msk [vmem:[%s290_s29 + $0x4] sm:$0xf] %vm362_vm1, %v361_v16 }
  0xc6   : > { %748 = shalt.err (!%p745_p11)
}
  0xc7   : > { %s813_s28 = smov 64   ;;  %s814_s7 = smov 4  }
  0xc8   : > { %555 = dma.vmem_to_hbm [thread:$0]  (%p925_p13), %s382_s4, 128, %s384_s5, %s366_s11, %s813_s28, %s813_s28, %s814_s7  }
  0xc9 PF: > { %p575_p12 = scmp.ge.s32.totalorder %s807_s17, 2  ;;  %s398_s9 = sand.u32 1, %s787_s12  }
  0xca   : > { %s399_s10 = scalar_lea.sflag [#allocation5], %s398_s9 }
  0xcb   : > { %p569_p2 = pnand %p575_p12, %p929_p0 }
  0xcd   : > { %p570_p3 = pneg %p569_p2 }
  0xcf   : > { %782 = dma.done.wait (%p570_p3), %s399_s10, 128  }
  0xd0   : > { %784 = vsyncadd (%p570_p3), %s399_s10, 4294967168  ;;  %s20_s17 = sadd.s32 1, %s807_s17   ;;  %s1026_s12 = smov %s791_s13 }
  0xd1   : > { %p17_p1 = scmp.ge.s32.totalorder %s20_s17, 5   ;;  %s1027_s13 = smov %s795_s14 }
  0xd2   : > { %s1028_s14 = smov %s885_s24  ;;  %s1029_s15 = smov %s803_s16 }
  0xd3   : > { %s1030_s16 = smov %s1032_s18  ;;  %19 = sbr.rel (!%p17_p1) target bundleno = 7 (0x7), region = 102 }
  0xd8   :  { %405 = vsyncpa [#allocation4], 1 }
  0xd9   :  { %407 = vsyncpa [#allocation4 + $0x1], 1 }
  0xda   :  { %408 = vsyncpa [#allocation7], 1 }
  0xdb   :  { %410 = vsyncpa [#allocation7 + $0x1], 1 }
  0xdc   :  { %411 = vsyncpa [#allocation5], 1 }
  0xdd   :  { %413 = vsyncpa [#allocation5 + $0x1], 1 }

</bundles_post_ra>
